<compile_context>
chip_gen: v7x
topology: tpu7x:2x2x1
jax: 0.10.0
libtpu: 0.0.40
codegen_flags: <defaults>
</compile_context>

<pallas_src>
import functools

import jax
import jax.numpy as jnp
from jax.experimental import pallas as pl
from jax.experimental.pallas import tpu as pltpu

_LANES = 128
_MAX_BLOCK_ROWS = 1024  # (1024, 128) f32 block = 512 KiB per stream per buffer


def _surv_point_loss_kernel(mu_ref, ind_ref, t_ref, est_ref, out_ref, acc_ref,
                            *, sigma: float, measure: str, n: int,
                            block_rows: int, num_blocks: int, num_acc: int):
    p = pl.program_id(0)   # "parallel" part axis
    b = pl.program_id(1)   # "arbitrary" reduction axis

    @pl.when(b == 0)
    def _init():
        acc_ref[...] = jnp.zeros_like(acc_ref)

    ind = ind_ref[...]   # (block_rows, 128) uncensored indicator
    t = t_ref[...]       # (block_rows, 128) event time
    est = est_ref[...]   # (block_rows, 128) estimate

    # Validity mask built in-kernel (no mask stream from HBM).
    row = jax.lax.broadcasted_iota(jnp.int32, (block_rows, _LANES), 0)
    lane = jax.lax.broadcasted_iota(jnp.int32, (block_rows, _LANES), 1)
    base = (p * num_blocks + b) * (block_rows * _LANES)
    valid = (base + row * _LANES + lane) < n

    inv_sigma = 1.0 / float(sigma)
    z = (t - est) * inv_sigma
    is_less = 1.0 / (1.0 + jnp.exp(-z))          # EUP exp; divide hidden under HBM-bound loop
    w = ind + (1.0 - ind) * is_less
    w = jnp.where(valid, w, 0.0)                 # padding lanes contribute 0
    tm = jnp.where(valid, t, 0.0)

    def fold(x):
        # (block_rows, 128) -> (8, 128): leading-axis sum == pure VPU vreg adds.
        return x.reshape(block_rows // 8, 8, _LANES).sum(axis=0)

    if measure == 'mse':
        w2 = w * w
        dw = (t - est) * w
        acc_ref[0] += fold(tm)              # sum t          (for mu)
        acc_ref[1] += fold(w2)              # sum w^2
        acc_ref[2] += fold(tm * w2)         # sum t   w^2
        acc_ref[3] += fold(tm * tm * w2)    # sum t^2 w^2
        acc_ref[4] += fold(dw * dw)         # sum ((t-est) w)^2  (numerator)
    elif measure == 'mae':
        mu = mu_ref[0, 0]
        acc_ref[0] += fold(jnp.abs(t - mu) * w)    # denominator sum
        acc_ref[1] += fold(jnp.abs(t - est) * w)   # numerator sum
    else:
        raise NotImplementedError("Currently only support 'mse', and 'mae' losses.")

    @pl.when(b == num_blocks - 1)
    def _finalize():
        # One XLU reduction per accumulator per part; pack scalars into a
        # lane-dense (1, 128) output row for this part.
        lane1 = jax.lax.broadcasted_iota(jnp.int32, (1, _LANES), 1)
        row_out = jnp.zeros((1, _LANES), jnp.float32)
        for q in range(num_acc):
            s = jnp.sum(acc_ref[q])
            row_out = jnp.where(lane1 == q, s, row_out)
        out_ref[...] = row_out


def survival_point_loss(event_indicator, event_time, estimate,
                        sigma: float = 0.1, measure: str = 'mse',
                        dtype=jnp.float32, max_block_rows: int = _MAX_BLOCK_ROWS):
    """JAX/Pallas equivalent of SurvivalPointLoss.forward. Returns a scalar loss."""
    if measure not in ('mse', 'mae'):
        raise NotImplementedError("Currently only support 'mse', and 'mae' losses.")

    ind = jnp.asarray(event_indicator, dtype=jnp.float32).reshape(-1)
    t = jnp.asarray(event_time, dtype=jnp.float32).reshape(-1)
    est = jnp.asarray(estimate, dtype=jnp.float32).reshape(-1)

    n = int(ind.shape[0])
    rows = pl.cdiv(n, _LANES)
    max_block_rows = max(8, (int(max_block_rows) // 8) * 8)
    block_rows = min(max_block_rows, ((rows + 7) // 8) * 8)   # multiple of 8
    total_blocks = pl.cdiv(rows, block_rows)
    # Leading "parallel" axis: 2-way split across TensorCores on v7x; on single-TC
    # chips it is just a near-free sequential outer loop.
    num_parts = 2 if total_blocks >= 2 else 1
    num_blocks = pl.cdiv(total_blocks, num_parts)
    total_rows = num_parts * num_blocks * block_rows
    pad = total_rows * _LANES - n

    def _tile(x):
        # TODO(synk): pad only when N is not already a multiple of the tile; the
        # pad copy is minimal (<= one block) and masked in-kernel.
        if pad:
            x = jnp.pad(x, (0, pad))
        return x.reshape(total_rows, _LANES)

    ind2, t2, est2 = _tile(ind), _tile(t), _tile(est)

    if measure == 'mse':
        num_acc = 5
        mu2 = jnp.zeros((1, 1), jnp.float32)          # unused for mse
    else:  # 'mae' — cheap one-stream mean, kernel then needs a single sweep
        num_acc = 2
        mu2 = jnp.mean(t).astype(jnp.float32).reshape(1, 1)

    kernel = functools.partial(
        _surv_point_loss_kernel, sigma=float(sigma), measure=measure, n=n,
        block_rows=block_rows, num_blocks=num_blocks, num_acc=num_acc)

    stream_spec = pl.BlockSpec((block_rows, _LANES),
                               lambda p, b: (p * num_blocks + b, 0))

    partial_sums = pl.pallas_call(
        kernel,
        out_shape=jax.ShapeDtypeStruct((num_parts, _LANES), jnp.float32),
        grid_spec=pltpu.PrefetchScalarGridSpec(
            num_scalar_prefetch=0,
            grid=(num_parts, num_blocks),
            in_specs=[pl.BlockSpec((1, 1), lambda p, b: (0, 0)),   # mu scalar
                      stream_spec, stream_spec, stream_spec],
            out_specs=pl.BlockSpec((1, _LANES), lambda p, b: (p, 0)),
            scratch_shapes=[pltpu.VMEM((num_acc, 8, _LANES), jnp.float32)],
        ),
        compiler_params=pltpu.CompilerParams(
            dimension_semantics=("parallel", "arbitrary")),
    )(mu2, ind2, t2, est2)

    # Tiny scalar finalize in the wrapper (combines per-part partial sums).
    sums = jnp.sum(partial_sums[:, :num_acc], axis=0)
    if measure == 'mse':
        sum_t, sum_w2, sum_tw2, sum_t2w2, sum_num = (sums[i] for i in range(5))
        mu = sum_t / n
        v = sum_t2w2 - 2.0 * mu * sum_tw2 + mu * mu * sum_w2 + 1e-05
        loss = sum_num / v
    else:
        loss = sums[1] / (sums[0] + 1e-05)
    return loss.astype(dtype)


def _reference(event_indicator, event_time, estimate, sigma=0.1, measure='mse'):
    t = event_time.astype(jnp.float32)
    uc = event_indicator.astype(jnp.float32)
    c_ind = 1.0 - uc
    is_less = jax.nn.sigmoid((t - estimate) / sigma)
    w = uc + c_ind * is_less
    mu = jnp.mean(t)
    if measure == 'mse':
        v = jnp.sum(((t - mu) * w) ** 2) + 1e-05
        return jnp.sum(((t - estimate) * w) ** 2) / v
    else:
        v = jnp.sum(jnp.abs(t - mu) * w) + 1e-05
        return jnp.sum(jnp.abs(t - estimate) * w) / v


if __name__ == "__main__":
    key = jax.random.PRNGKey(0)

    # Small shape consistent with the module (num_sample = 8).
    k1, k2, k3 = jax.random.split(key, 3)
    N = 8
    event_indicator = (jax.random.uniform(k1, (N,)) > 0.5).astype(jnp.float32)
    event_time = jax.random.uniform(k2, (N,), minval=0.1, maxval=5.0)
    estimate = jax.random.uniform(k3, (N,), minval=0.1, maxval=5.0)

    loss_mse = survival_point_loss(event_indicator, event_time, estimate,
                                   sigma=0.1, measure='mse')
    loss_mae = survival_point_loss(event_indicator, event_time, estimate,
                                   sigma=0.1, measure='mae')
    jax.block_until_ready((loss_mse, loss_mae))

    ref_mse = _reference(event_indicator, event_time, estimate, measure='mse')
    ref_mae = _reference(event_indicator, event_time, estimate, measure='mae')
    assert jnp.allclose(loss_mse, ref_mse, rtol=1e-4, atol=1e-5), (loss_mse, ref_mse)
    assert jnp.allclose(loss_mae, ref_mae, rtol=1e-4, atol=1e-5), (loss_mae, ref_mae)

    # Second case exercising the tiled grid, 2-part "parallel" axis and the
    # in-kernel ragged-tail mask (small block size forced for the test).
    k4, k5, k6 = jax.random.split(jax.random.PRNGKey(0), 3)
    N2 = 3000
    ei2 = (jax.random.uniform(k4, (N2,)) > 0.5).astype(jnp.float32)
    et2 = jax.random.uniform(k5, (N2,), minval=0.1, maxval=5.0)
    es2 = jax.random.uniform(k6, (N2,), minval=0.1, maxval=5.0)

    tiled_mse = survival_point_loss(ei2, et2, es2, sigma=0.1, measure='mse',
                                    max_block_rows=8)
    tiled_mae = survival_point_loss(ei2, et2, es2, sigma=0.1, measure='mae',
                                    max_block_rows=8)
    jax.block_until_ready((tiled_mse, tiled_mae))
    assert jnp.allclose(tiled_mse, _reference(ei2, et2, es2, measure='mse'),
                        rtol=1e-4, atol=1e-5)
    assert jnp.allclose(tiled_mae, _reference(ei2, et2, es2, measure='mae'),
                        rtol=1e-4, atol=1e-5)

    print("KERNEL_OK")
</pallas_src>

<mosaic_0001>
module attributes {stable_mosaic.version = 11 : i64} {
  func.func @_surv_point_loss_kernel(%arg0: i32, %arg1: i32, %arg2: memref<1x1xf32, #tpu.memory_space<vmem>>, %arg3: memref<8x128xf32, #tpu.memory_space<vmem>>, %arg4: memref<8x128xf32, #tpu.memory_space<vmem>>, %arg5: memref<8x128xf32, #tpu.memory_space<vmem>>, %arg6: memref<1x128xf32, #tpu.memory_space<vmem>>, %arg7: memref<5x8x128xf32, #tpu.memory_space<vmem>>) attributes {dimension_semantics = [#tpu.dimension_semantics<parallel>, #tpu.dimension_semantics<arbitrary>], iteration_bounds = array<i64: 1, 1>, scalar_prefetch = 0 : i64, scratch_operands = 1 : i64, tpu.core_type = #tpu.core_type<tc>, window_params = [{pipeline_mode = #tpu.pipeline_mode<synchronous>, transform_indices = @transform_0, window_bounds = array<i64: 1, 1>}, {transform_indices = @transform_1, window_bounds = array<i64: 8, 128>}, {transform_indices = @transform_2, window_bounds = array<i64: 8, 128>}, {transform_indices = @transform_3, window_bounds = array<i64: 8, 128>}, {transform_indices = @transform_4, window_bounds = array<i64: 1, 128>}]} {
    %c0_i32 = arith.constant 0 : i32
    %0 = arith.cmpi eq, %arg1, %c0_i32 : i32
    %1 = arith.extui %0 : i1 to i32
    %c0_i32_0 = arith.constant 0 : i32
    %2 = arith.cmpi ne, %1, %c0_i32_0 : i32
    scf.if %2 {
      %cst_45 = arith.constant 0.000000e+00 : f32
      %86 = vector.broadcast %cst_45 : f32 to vector<5x8x128xf32>
      %c0_46 = arith.constant 0 : index
      %c0_47 = arith.constant 0 : index
      %c0_48 = arith.constant 0 : index
      %87 = vector.load %arg7[%c0_46, %c0_47, %c0_48] : memref<5x8x128xf32, #tpu.memory_space<vmem>>, vector<5x8x128xf32>
      tpu.vector_store %arg7[%c0_46, %c0_47, %c0_48], %86 {strides = array<i32>} : memref<5x8x128xf32, #tpu.memory_space<vmem>>, vector<5x8x128xf32>,
    } else {
    }
    %c0 = arith.constant 0 : index
    %c0_1 = arith.constant 0 : index
    %3 = vector.load %arg3[%c0, %c0_1] : memref<8x128xf32, #tpu.memory_space<vmem>>, vector<8x128xf32>
    %c0_2 = arith.constant 0 : index
    %c0_3 = arith.constant 0 : index
    %4 = vector.load %arg4[%c0_2, %c0_3] : memref<8x128xf32, #tpu.memory_space<vmem>>, vector<8x128xf32>
    %c0_4 = arith.constant 0 : index
    %c0_5 = arith.constant 0 : index
    %5 = vector.load %arg5[%c0_4, %c0_5] : memref<8x128xf32, #tpu.memory_space<vmem>>, vector<8x128xf32>
    %6 = tpu.iota {dimensions = array<i32: 0>} : vector<8x128xi32>
    %7 = tpu.iota {dimensions = array<i32: 1>} : vector<8x128xi32>
    %c1_i32 = arith.constant 1 : i32
    %8 = arith.muli %arg0, %c1_i32 : i32
    %9 = arith.addi %8, %arg1 : i32
    %c1024_i32 = arith.constant 1024 : i32
    %10 = arith.muli %9, %c1024_i32 : i32
    %c128_i32 = arith.constant 128 : i32
    %11 = vector.broadcast %c128_i32 : i32 to vector<8x128xi32>
    %12 = arith.muli %6, %11 : vector<8x128xi32>
    %13 = vector.broadcast %10 : i32 to vector<8x128xi32>
    %14 = arith.addi %13, %12 : vector<8x128xi32>
    %15 = arith.addi %14, %7 : vector<8x128xi32>
    %c8_i32 = arith.constant 8 : i32
    %16 = vector.broadcast %c8_i32 : i32 to vector<8x128xi32>
    %17 = arith.cmpi slt, %15, %16 : vector<8x128xi32>
    %18 = arith.subf %4, %5 : vector<8x128xf32>
    %cst = arith.constant 1.000000e+01 : f32
    %19 = vector.broadcast %cst : f32 to vector<8x128xf32>
    %20 = arith.mulf %18, %19 : vector<8x128xf32>
    %cst_6 = arith.constant 0.000000e+00 : f32
    %21 = vector.broadcast %cst_6 : f32 to vector<8x128xf32>
    %22 = arith.subf %21, %20 : vector<8x128xf32>
    %23 = math.exp %22 : vector<8x128xf32>
    %cst_7 = arith.constant 1.000000e+00 : f32
    %24 = vector.broadcast %cst_7 : f32 to vector<8x128xf32>
    %25 = arith.addf %24, %23 : vector<8x128xf32>
    %cst_8 = arith.constant 1.000000e+00 : f32
    %26 = vector.broadcast %cst_8 : f32 to vector<8x128xf32>
    %27 = arith.divf %26, %25 : vector<8x128xf32>
    %cst_9 = arith.constant 1.000000e+00 : f32
    %28 = vector.broadcast %cst_9 : f32 to vector<8x128xf32>
    %29 = arith.subf %28, %3 : vector<8x128xf32>
    %30 = arith.mulf %29, %27 : vector<8x128xf32>
    %31 = arith.addf %3, %30 : vector<8x128xf32>
    %cst_10 = arith.constant 0.000000e+00 : f32
    %32 = vector.broadcast %cst_10 : f32 to vector<8x128xf32>
    %33 = arith.select %17, %31, %32 : vector<8x128xi1>, vector<8x128xf32>
    %cst_11 = arith.constant 0.000000e+00 : f32
    %34 = vector.broadcast %cst_11 : f32 to vector<8x128xf32>
    %35 = arith.select %17, %4, %34 : vector<8x128xi1>, vector<8x128xf32>
    %36 = arith.mulf %33, %33 : vector<8x128xf32>
    %37 = arith.subf %4, %5 : vector<8x128xf32>
    %38 = arith.mulf %37, %33 : vector<8x128xf32>
    %c0_12 = arith.constant 0 : index
    %c0_13 = arith.constant 0 : index
    %c0_14 = arith.constant 0 : index
    %39 = vector.load %arg7[%c0_12, %c0_13, %c0_14] : memref<5x8x128xf32, #tpu.memory_space<vmem>>, vector<1x8x128xf32>
    %40 = vector.shape_cast %39 : vector<1x8x128xf32> to vector<8x128xf32>
    %41 = vector.shape_cast %35 : vector<8x128xf32> to vector<1x8x128xf32>
    %cst_15 = arith.constant dense<0.000000e+00> : vector<8x128xf32>
    %42 = vector.multi_reduction <add>, %41, %cst_15 [0] : vector<1x8x128xf32> to vector<8x128xf32>
    %43 = arith.addf %40, %42 : vector<8x128xf32>
    %c0_16 = arith.constant 0 : index
    %c0_17 = arith.constant 0 : index
    %c0_18 = arith.constant 0 : index
    %44 = vector.load %arg7[%c0_16, %c0_17, %c0_18] : memref<5x8x128xf32, #tpu.memory_space<vmem>>, vector<1x8x128xf32>
    %45 = vector.shape_cast %44 : vector<1x8x128xf32> to vector<8x128xf32>
    %46 = vector.shape_cast %43 : vector<8x128xf32> to vector<1x8x128xf32>
    tpu.vector_store %arg7[%c0_16, %c0_17, %c0_18], %46 {strides = array<i32>} : memref<5x8x128xf32, #tpu.memory_space<vmem>>, vector<1x8x128xf32>,
    %c1 = arith.constant 1 : index
    %c0_19 = arith.constant 0 : index
    %c0_20 = arith.constant 0 : index
    %47 = vector.load %arg7[%c1, %c0_19, %c0_20] : memref<5x8x128xf32, #tpu.memory_space<vmem>>, vector<1x8x128xf32>
    %48 = vector.shape_cast %47 : vector<1x8x128xf32> to vector<8x128xf32>
    %49 = vector.shape_cast %36 : vector<8x128xf32> to vector<1x8x128xf32>
    %cst_21 = arith.constant dense<0.000000e+00> : vector<8x128xf32>
    %50 = vector.multi_reduction <add>, %49, %cst_21 [0] : vector<1x8x128xf32> to vector<8x128xf32>
    %51 = arith.addf %48, %50 : vector<8x128xf32>
    %c1_22 = arith.constant 1 : index
    %c0_23 = arith.constant 0 : index
    %c0_24 = arith.constant 0 : index
    %52 = vector.load %arg7[%c1_22, %c0_23, %c0_24] : memref<5x8x128xf32, #tpu.memory_space<vmem>>, vector<1x8x128xf32>
    %53 = vector.shape_cast %52 : vector<1x8x128xf32> to vector<8x128xf32>
    %54 = vector.shape_cast %51 : vector<8x128xf32> to vector<1x8x128xf32>
    tpu.vector_store %arg7[%c1_22, %c0_23, %c0_24], %54 {strides = array<i32>} : memref<5x8x128xf32, #tpu.memory_space<vmem>>, vector<1x8x128xf32>,
    %c2 = arith.constant 2 : index
    %c0_25 = arith.constant 0 : index
    %c0_26 = arith.constant 0 : index
    %55 = vector.load %arg7[%c2, %c0_25, %c0_26] : memref<5x8x128xf32, #tpu.memory_space<vmem>>, vector<1x8x128xf32>
    %56 = vector.shape_cast %55 : vector<1x8x128xf32> to vector<8x128xf32>
    %57 = arith.mulf %35, %36 : vector<8x128xf32>
    %58 = vector.shape_cast %57 : vector<8x128xf32> to vector<1x8x128xf32>
    %cst_27 = arith.constant dense<0.000000e+00> : vector<8x128xf32>
    %59 = vector.multi_reduction <add>, %58, %cst_27 [0] : vector<1x8x128xf32> to vector<8x128xf32>
    %60 = arith.addf %56, %59 : vector<8x128xf32>
    %c2_28 = arith.constant 2 : index
    %c0_29 = arith.constant 0 : index
    %c0_30 = arith.constant 0 : index
    %61 = vector.load %arg7[%c2_28, %c0_29, %c0_30] : memref<5x8x128xf32, #tpu.memory_space<vmem>>, vector<1x8x128xf32>
    %62 = vector.shape_cast %61 : vector<1x8x128xf32> to vector<8x128xf32>
    %63 = vector.shape_cast %60 : vector<8x128xf32> to vector<1x8x128xf32>
    tpu.vector_store %arg7[%c2_28, %c0_29, %c0_30], %63 {strides = array<i32>} : memref<5x8x128xf32, #tpu.memory_space<vmem>>, vector<1x8x128xf32>,
    %c3 = arith.constant 3 : index
    %c0_31 = arith.constant 0 : index
    %c0_32 = arith.constant 0 : index
    %64 = vector.load %arg7[%c3, %c0_31, %c0_32] : memref<5x8x128xf32, #tpu.memory_space<vmem>>, vector<1x8x128xf32>
    %65 = vector.shape_cast %64 : vector<1x8x128xf32> to vector<8x128xf32>
    %66 = arith.mulf %35, %35 : vector<8x128xf32>
    %67 = arith.mulf %66, %36 : vector<8x128xf32>
    %68 = vector.shape_cast %67 : vector<8x128xf32> to vector<1x8x128xf32>
    %cst_33 = arith.constant dense<0.000000e+00> : vector<8x128xf32>
    %69 = vector.multi_reduction <add>, %68, %cst_33 [0] : vector<1x8x128xf32> to vector<8x128xf32>
    %70 = arith.addf %65, %69 : vector<8x128xf32>
    %c3_34 = arith.constant 3 : index
    %c0_35 = arith.constant 0 : index
    %c0_36 = arith.constant 0 : index
    %71 = vector.load %arg7[%c3_34, %c0_35, %c0_36] : memref<5x8x128xf32, #tpu.memory_space<vmem>>, vector<1x8x128xf32>
    %72 = vector.shape_cast %71 : vector<1x8x128xf32> to vector<8x128xf32>
    %73 = vector.shape_cast %70 : vector<8x128xf32> to vector<1x8x128xf32>
    tpu.vector_store %arg7[%c3_34, %c0_35, %c0_36], %73 {strides = array<i32>} : memref<5x8x128xf32, #tpu.memory_space<vmem>>, vector<1x8x128xf32>,
    %c4 = arith.constant 4 : index
    %c0_37 = arith.constant 0 : index
    %c0_38 = arith.constant 0 : index
    %74 = vector.load %arg7[%c4, %c0_37, %c0_38] : memref<5x8x128xf32, #tpu.memory_space<vmem>>, vector<1x8x128xf32>
    %75 = vector.shape_cast %74 : vector<1x8x128xf32> to vector<8x128xf32>
    %76 = arith.mulf %38, %38 : vector<8x128xf32>
    %77 = vector.shape_cast %76 : vector<8x128xf32> to vector<1x8x128xf32>
    %cst_39 = arith.constant dense<0.000000e+00> : vector<8x128xf32>
    %78 = vector.multi_reduction <add>, %77, %cst_39 [0] : vector<1x8x128xf32> to vector<8x128xf32>
    %79 = arith.addf %75, %78 : vector<8x128xf32>
    %c4_40 = arith.constant 4 : index
    %c0_41 = arith.constant 0 : index
    %c0_42 = arith.constant 0 : index
    %80 = vector.load %arg7[%c4_40, %c0_41, %c0_42] : memref<5x8x128xf32, #tpu.memory_space<vmem>>, vector<1x8x128xf32>
    %81 = vector.shape_cast %80 : vector<1x8x128xf32> to vector<8x128xf32>
    %82 = vector.shape_cast %79 : vector<8x128xf32> to vector<1x8x128xf32>
    tpu.vector_store %arg7[%c4_40, %c0_41, %c0_42], %82 {strides = array<i32>} : memref<5x8x128xf32, #tpu.memory_space<vmem>>, vector<1x8x128xf32>,
    %c0_i32_43 = arith.constant 0 : i32
    %83 = arith.cmpi eq, %arg1, %c0_i32_43 : i32
    %84 = arith.extui %83 : i1 to i32
    %c0_i32_44 = arith.constant 0 : i32
    %85 = arith.cmpi ne, %84, %c0_i32_44 : i32
    scf.if %85 {
      %86 = tpu.iota {dimensions = array<i32: 1>} : vector<1x128xi32>
      %cst_45 = arith.constant 0.000000e+00 : f32
      %87 = vector.broadcast %cst_45 : f32 to vector<1x128xf32>
      %c0_46 = arith.constant 0 : index
      %c0_47 = arith.constant 0 : index
      %c0_48 = arith.constant 0 : index
      %88 = vector.load %arg7[%c0_46, %c0_47, %c0_48] : memref<5x8x128xf32, #tpu.memory_space<vmem>>, vector<1x8x128xf32>
      %89 = vector.shape_cast %88 : vector<1x8x128xf32> to vector<8x128xf32>
      %90 = vector.shape_cast %89 : vector<8x128xf32> to vector<1x8x128xf32>
      %cst_49 = arith.constant dense<0.000000e+00> : vector<1xf32>
      %91 = vector.multi_reduction <add>, %90, %cst_49 [1, 2] : vector<1x8x128xf32> to vector<1xf32>
      %92 = vector.shape_cast %91 : vector<1xf32> to vector<1x1x1xf32>
      %93 = vector.extract %92[0, 0, 0] : f32 from vector<1x1x1xf32>
      %c0_i32_50 = arith.constant 0 : i32
      %94 = vector.broadcast %c0_i32_50 : i32 to vector<1x128xi32>
      %95 = arith.cmpi eq, %86, %94 : vector<1x128xi32>
      %96 = vector.broadcast %93 : f32 to vector<1x128xf32>
      %97 = arith.select %95, %96, %87 : vector<1x128xi1>, vector<1x128xf32>
      %c1_51 = arith.constant 1 : index
      %c0_52 = arith.constant 0 : index
      %c0_53 = arith.constant 0 : index
      %98 = vector.load %arg7[%c1_51, %c0_52, %c0_53] : memref<5x8x128xf32, #tpu.memory_space<vmem>>, vector<1x8x128xf32>
      %99 = vector.shape_cast %98 : vector<1x8x128xf32> to vector<8x128xf32>
      %100 = vector.shape_cast %99 : vector<8x128xf32> to vector<1x8x128xf32>
      %cst_54 = arith.constant dense<0.000000e+00> : vector<1xf32>
      %101 = vector.multi_reduction <add>, %100, %cst_54 [1, 2] : vector<1x8x128xf32> to vector<1xf32>
      %102 = vector.shape_cast %101 : vector<1xf32> to vector<1x1x1xf32>
      %103 = vector.extract %102[0, 0, 0] : f32 from vector<1x1x1xf32>
      %c1_i32_55 = arith.constant 1 : i32
      %104 = vector.broadcast %c1_i32_55 : i32 to vector<1x128xi32>
      %105 = arith.cmpi eq, %86, %104 : vector<1x128xi32>
      %106 = vector.broadcast %103 : f32 to vector<1x128xf32>
      %107 = arith.select %105, %106, %97 : vector<1x128xi1>, vector<1x128xf32>
      %c2_56 = arith.constant 2 : index
      %c0_57 = arith.constant 0 : index
      %c0_58 = arith.constant 0 : index
      %108 = vector.load %arg7[%c2_56, %c0_57, %c0_58] : memref<5x8x128xf32, #tpu.memory_space<vmem>>, vector<1x8x128xf32>
      %109 = vector.shape_cast %108 : vector<1x8x128xf32> to vector<8x128xf32>
      %110 = vector.shape_cast %109 : vector<8x128xf32> to vector<1x8x128xf32>
      %cst_59 = arith.constant dense<0.000000e+00> : vector<1xf32>
      %111 = vector.multi_reduction <add>, %110, %cst_59 [1, 2] : vector<1x8x128xf32> to vector<1xf32>
      %112 = vector.shape_cast %111 : vector<1xf32> to vector<1x1x1xf32>
      %113 = vector.extract %112[0, 0, 0] : f32 from vector<1x1x1xf32>
      %c2_i32 = arith.constant 2 : i32
      %114 = vector.broadcast %c2_i32 : i32 to vector<1x128xi32>
      %115 = arith.cmpi eq, %86, %114 : vector<1x128xi32>
      %116 = vector.broadcast %113 : f32 to vector<1x128xf32>
      %117 = arith.select %115, %116, %107 : vector<1x128xi1>, vector<1x128xf32>
      %c3_60 = arith.constant 3 : index
      %c0_61 = arith.constant 0 : index
      %c0_62 = arith.constant 0 : index
      %118 = vector.load %arg7[%c3_60, %c0_61, %c0_62] : memref<5x8x128xf32, #tpu.memory_space<vmem>>, vector<1x8x128xf32>
      %119 = vector.shape_cast %118 : vector<1x8x128xf32> to vector<8x128xf32>
      %120 = vector.shape_cast %119 : vector<8x128xf32> to vector<1x8x128xf32>
      %cst_63 = arith.constant dense<0.000000e+00> : vector<1xf32>
      %121 = vector.multi_reduction <add>, %120, %cst_63 [1, 2] : vector<1x8x128xf32> to vector<1xf32>
      %122 = vector.shape_cast %121 : vector<1xf32> to vector<1x1x1xf32>
      %123 = vector.extract %122[0, 0, 0] : f32 from vector<1x1x1xf32>
      %c3_i32 = arith.constant 3 : i32
      %124 = vector.broadcast %c3_i32 : i32 to vector<1x128xi32>
      %125 = arith.cmpi eq, %86, %124 : vector<1x128xi32>
      %126 = vector.broadcast %123 : f32 to vector<1x128xf32>
      %127 = arith.select %125, %126, %117 : vector<1x128xi1>, vector<1x128xf32>
      %c4_64 = arith.constant 4 : index
      %c0_65 = arith.constant 0 : index
      %c0_66 = arith.constant 0 : index
      %128 = vector.load %arg7[%c4_64, %c0_65, %c0_66] : memref<5x8x128xf32, #tpu.memory_space<vmem>>, vector<1x8x128xf32>
      %129 = vector.shape_cast %128 : vector<1x8x128xf32> to vector<8x128xf32>
      %130 = vector.shape_cast %129 : vector<8x128xf32> to vector<1x8x128xf32>
      %cst_67 = arith.constant dense<0.000000e+00> : vector<1xf32>
      %131 = vector.multi_reduction <add>, %130, %cst_67 [1, 2] : vector<1x8x128xf32> to vector<1xf32>
      %132 = vector.shape_cast %131 : vector<1xf32> to vector<1x1x1xf32>
      %133 = vector.extract %132[0, 0, 0] : f32 from vector<1x1x1xf32>
      %c4_i32 = arith.constant 4 : i32
      %134 = vector.broadcast %c4_i32 : i32 to vector<1x128xi32>
      %135 = arith.cmpi eq, %86, %134 : vector<1x128xi32>
      %136 = vector.broadcast %133 : f32 to vector<1x128xf32>
      %137 = arith.select %135, %136, %127 : vector<1x128xi1>, vector<1x128xf32>
      %c0_68 = arith.constant 0 : index
      %c0_69 = arith.constant 0 : index
      %138 = vector.load %arg6[%c0_68, %c0_69] : memref<1x128xf32, #tpu.memory_space<vmem>>, vector<1x128xf32>
      tpu.vector_store %arg6[%c0_68, %c0_69], %137 {strides = array<i32>} : memref<1x128xf32, #tpu.memory_space<vmem>>, vector<1x128xf32>,
    } else {
    }
    return
  }
  func.func @transform_0(%arg0: i32, %arg1: i32) -> (i32, i32) {
    %c0_i32 = arith.constant 0 : i32
    %c0_i32_0 = arith.constant 0 : i32
    %c0_i32_1 = arith.constant 0 : i32
    return %c0_i32, %c0_i32_0 : i32, i32
  }
  func.func @transform_1(%arg0: i32, %arg1: i32) -> (i32, i32) {
    %c1_i32 = arith.constant 1 : i32
    %0 = arith.muli %arg0, %c1_i32 : i32
    %1 = arith.addi %0, %arg1 : i32
    %c0_i32 = arith.constant 0 : i32
    %c0_i32_0 = arith.constant 0 : i32
    return %1, %c0_i32 : i32, i32
  }
  func.func @transform_2(%arg0: i32, %arg1: i32) -> (i32, i32) {
    %c1_i32 = arith.constant 1 : i32
    %0 = arith.muli %arg0, %c1_i32 : i32
    %1 = arith.addi %0, %arg1 : i32
    %c0_i32 = arith.constant 0 : i32
    %c0_i32_0 = arith.constant 0 : i32
    return %1, %c0_i32 : i32, i32
  }
  func.func @transform_3(%arg0: i32, %arg1: i32) -> (i32, i32) {
    %c1_i32 = arith.constant 1 : i32
    %0 = arith.muli %arg0, %c1_i32 : i32
    %1 = arith.addi %0, %arg1 : i32
    %c0_i32 = arith.constant 0 : i32
    %c0_i32_0 = arith.constant 0 : i32
    return %1, %c0_i32 : i32, i32
  }
  func.func @transform_4(%arg0: i32, %arg1: i32) -> (i32, i32) {
    %c0_i32 = arith.constant 0 : i32
    %c0_i32_0 = arith.constant 0 : i32
    return %arg0, %c0_i32 : i32, i32
  }
}

</mosaic_0001>

<bundles_post_ra>
// kernel: tpu_custom_call.1
= control target key start
LH: loop header
LB: loop body
LE: loop exit
PB: predicated region body
PF: predicated region fallthrough
CT: control target
= control target key end

     0   :  { %11 = vsyncpa [#allocation5], 0  ;;  %s392_s0 = inlined_call_operand.<no memory space> [shape: f32[1,1], index: 0, kind: input, shape index: {}]   ;;  %s393_s1 = inlined_call_operand.hbm [shape: f32[8,128], index: 1, kind: input, shape index: {}]   ;;  %s394_s2 = inlined_call_operand.hbm [shape: f32[8,128], index: 2, kind: input, shape index: {}]   ;;  %s395_s3 = inlined_call_operand.vmem [shape: f32[8,128], index: 3, kind: input, shape index: {}]   ;;  %s396_s4 = inlined_call_operand.hbm [shape: f32[1,128], index: 4, kind: output, shape index: {}]  }
   0x1   :  { %12 = vsyncpa [#allocation8], 0 }
   0x2   :  { %13 = vsyncpa [#allocation6], 0  ;;  %s315_s15 = smov [#allocation4]   ;;  %s316_s17 = smov [#allocation7]  }
   0x3   :  { %s25_s16 = sshll.u32 %s315_s15, 4  ;;  %s38_s18 = sshll.u32 %s316_s17, 4  ;;  %s26_s16 = int_to_ptr.vmem [resolvable:$true] %s25_s16  ;;  %s39_s18 = int_to_ptr.vmem [resolvable:$true] %s38_s18 }
   0x4   :  { %s243_s20 = scalar_lea.hbm %s393_s1, 128 }
   0x5   :  { %p244_p0 = scmp.ne.s32.totalorder %s393_s1, %s243_s20  ;;  %p247_p1 = scmp.lt.u32.totalorder %s243_s20, %s393_s1 }
   0x7   :  { %p249_p2 = pnand %p247_p1, %p244_p0 }
   0x9   :  { %252 = shalt.err (!%p249_p2)
}
   0xa   :  { %s253_s25 = scalar_lea.vmem %s26_s16, 128  ;;  %p258_p4 = scmp.lt.s32.totalorder %s26_s16, %s26_s16 }
   0xb   :  { %p254_p3 = scmp.ne.s32.totalorder %s26_s16, %s253_s25  ;;  %p259_p5 = scmp.lt.s32.totalorder %s253_s25, %s253_s25 }
   0xd   :  { %p260_p6 = por %p259_p5, %p258_p4 }
   0xf   :  { %p261_p7 = pnand %p260_p6, %p254_p3 }
  0x11   :  { %264 = shalt.err (!%p261_p7)
}
  0x12   :  { %28 = dma.hbm_to_vmem [thread:$0]  %s393_s1, 128, %s26_s16, [#allocation5]  }
  0x13   :  { %s265_s30 = scalar_lea.hbm %s394_s2, 128 }
  0x14   :  { %p266_p8 = scmp.ne.s32.totalorder %s394_s2, %s265_s30  ;;  %p269_p9 = scmp.lt.u32.totalorder %s265_s30, %s394_s2 }
  0x16   :  { %p271_p10 = pnand %p269_p9, %p266_p8 }
  0x18   :  { %274 = shalt.err (!%p271_p10)
}
  0x19   :  { %s275_s9 = scalar_lea.vmem %s39_s18, 128  ;;  %p280_p12 = scmp.lt.s32.totalorder %s39_s18, %s39_s18 }
  0x1a   :  { %p276_p11 = scmp.ne.s32.totalorder %s39_s18, %s275_s9  ;;  %p281_p13 = scmp.lt.s32.totalorder %s275_s9, %s275_s9 }
  0x1c   :  { %p282_p0 = por %p281_p13, %p280_p12 }
  0x1e   :  { %p283_p1 = pnand %p282_p0, %p276_p11 }
  0x20   :  { %286 = shalt.err (!%p283_p1)
}
  0x21   :  { %41 = dma.hbm_to_vmem [thread:$0]  %s394_s2, 128, %s39_s18, [#allocation8]  }
  0x22   :  { %309 = dma.done.wait [#allocation5], 128  }
  0x23   :  { %310 = vsyncadd [#allocation5], 4294967168 }
  0x24   :  { %311 = dma.done.wait [#allocation8], 128  }
  0x25   :  { %312 = vsyncadd [#allocation8], 4294967168  ;;  %v81_v0 = vlaneseq  ;;  %v79_v5 = vld [vmem:[#allocation7] sm:$0xff]  ;;  %v80_v6 = vld [vmem:[%s395_s3] sm:$0xff]  ;;  %s317_s14 = smov [#allocation9]  }
  0x26   :  { %v92_v7 = vsub.f32 %v79_v5, %v80_v6  ;;  %v78_v14 = vld [vmem:[#allocation4] sm:$0xff]  ;;  %s210_s15 = sshll.u32 %s317_s14, 4  ;;  %s211_s15 = int_to_ptr.vmem [resolvable:$true] %s210_s15 }
  0x27   :  { %v82_v1 = vshrl.u32 %v81_v0, 7  ;;  %v367_v2 = vand.u32 127, %v81_v0  ;;  %v100_v15 = vsub.f32 1.0, %v78_v14  ;;  %s287_s18 = scalar_lea.vmem %s211_s15, 16  ;;  %s291_s0 = scalar_lea.vmem %s211_s15, 32 }
  0x28   :  { %v93_v9 = vmul.f32 10.0, %v92_v7  ;;  %p288_p2 = scmp.ne.s32.totalorder %s211_s15, %s287_s18  ;;  %p292_p3 = scmp.lt.s32.totalorder %s211_s15, %s211_s15 }
  0x29   :  { %v87_v3 = vmul.u32 128, %v82_v1  ;;  %vm148_vm1 = vcmp.eq.s32.totalorder %v367_v2, 0  ;;  %vm161_vm2 = vcmp.eq.s32.totalorder %v367_v2, 1  ;;  %vm174_vm3 = vcmp.eq.s32.totalorder %v367_v2, 2  ;;  %p293_p4 = scmp.lt.s32.totalorder %s291_s0, %s287_s18 }
  0x2a   :  { %v94_v10 = vsub.f32 0.0, %v93_v9  ;;  %vm187_vm4 = vcmp.eq.s32.totalorder %v367_v2, 3  ;;  %vm200_vm5 = vcmp.eq.s32.totalorder %v367_v2, 4 }
  0x2b   :  { %v90_v4 = vadd.s32 %v87_v3, %v367_v2  ;;  %p294_p5 = por %p293_p4, %p292_p3 }
  0x2c   :  { %v95_v11 = vmul.f32 1.442695, %v94_v10 }
  0x2d   :  { %vm91_vm0 = vcmp.lt.s32.totalorder %v90_v4, 8  ;;  %p295_p6 = pnand %p294_p5, %p288_p2 }
  0x2e   :  { %v104_v8 = vsel %vm91_vm0, %v79_v5, 0.0  ;;  %239 = vpow2.f32 %v95_v11 }
  0x2f   :  { %139 = vadd.xlane.f32.xlu0 %v104_v8  ;;  %v124_v22 = vmul.f32 %v104_v8, %v104_v8 }
  0x38   :  { %v240_v12 = vpop.eup %239 }
  0x39   :  { %v97_v13 = vadd.f32 1.0, %v240_v12 }
  0x3b   :  { %241 = vrcp.f32 %v97_v13 }
  0x45   :  { %v242_v16 = vpop.eup %241 }
  0x46   :  { %v101_v17 = vmul.f32 %v242_v16, %v100_v15 }
  0x48   :  { %v102_v18 = vadd.f32 %v101_v17, %v78_v14 }
  0x4a   :  { %v103_v19 = vsel %vm91_vm0, %v102_v18, 0.0 }
  0x4b   :  { %v105_v20 = vmul.f32 %v103_v19, %v103_v19  ;;  %v106_v21 = vmul.f32 %v103_v19, %v92_v7 }
  0x4d   :  { %152 = vadd.xlane.f32.xlu0 %v105_v20  ;;  %v118_v23 = vmul.f32 %v105_v20, %v104_v8  ;;  %v131_v24 = vmul.f32 %v106_v21, %v106_v21  ;;  %v125_v25 = vmul.f32 %v124_v22, %v105_v20 }
  0x4f   :  { %165 = vadd.xlane.f32.xlu1 %v118_v23 }
  0x51   :  { %191 = vadd.xlane.f32.xlu0 %v131_v24 }
  0x53   :  { %178 = vadd.xlane.f32.xlu1 %v125_v25 }
  0xbc   :  { %v140_v26 = vpop.xlane.xlu0 %139 }
  0xbd   :  { %v141_v27 = vrot.slane %v140_v26, 4 }
  0xbf   :  { %v142_v28 = vadd.f32 %v141_v27, %v140_v26 }
  0xc1   :  { %v143_v29 = vrot.slane %v142_v28, 2 }
  0xc3   :  { %v144_v30 = vadd.f32 %v143_v29, %v142_v28 }
  0xc5   :  { %v145_v31 = vrot.slane %v144_v30, 1 }
  0xc7   :  { %v146_v32 = vadd.f32 %v145_v31, %v144_v30 }
  0xc9   :  { %226 = vpush %v146_v32 }
  0xda   :  { %v153_v33 = vpop.xlane.xlu0 %152 }
  0xdb   :  { %v154_v34 = vrot.slane %v153_v33, 4 }
  0xdc   :  { %v166_v35 = vpop.xlane.xlu1 %165 }
  0xdd   :  { %v155_v36 = vadd.f32 %v154_v34, %v153_v33  ;;  %v167_v37 = vrot.slane %v166_v35, 4 }
  0xde   :  { %v192_v38 = vpop.xlane.xlu0 %191 }
  0xdf   :  { %v156_v39 = vrot.slane %v155_v36, 2  ;;  %v168_v40 = vadd.f32 %v167_v37, %v166_v35  ;;  %v193_v41 = vrot.slane %v192_v38, 4 }
  0xe0   :  { %v179_v42 = vpop.xlane.xlu1 %178 }
  0xe1   :  { %v169_v43 = vrot.slane %v168_v40, 2  ;;  %v194_v44 = vadd.f32 %v193_v41, %v192_v38  ;;  %v180_v45 = vrot.slane %v179_v42, 4  ;;  %v157_v46 = vadd.f32 %v156_v39, %v155_v36 }
  0xe3   :  { %v195_v47 = vrot.slane %v194_v44, 2  ;;  %v181_v48 = vadd.f32 %v180_v45, %v179_v42  ;;  %v158_v49 = vrot.slane %v157_v46, 1  ;;  %v170_v50 = vadd.f32 %v169_v43, %v168_v40 }
  0xe5   :  { %v196_v51 = vadd.f32 %v195_v47, %v194_v44  ;;  %v182_v52 = vrot.slane %v181_v48, 2  ;;  %v159_v53 = vadd.f32 %v158_v49, %v157_v46  ;;  %v171_v54 = vrot.slane %v170_v50, 1 }
  0xe7   :  { %v183_v55 = vadd.f32 %v182_v52, %v181_v48  ;;  %228 = vpush %v159_v53  ;;  %v172_v56 = vadd.f32 %v171_v54, %v170_v50  ;;  %v197_v57 = vrot.slane %v196_v51, 1 }
  0xe9   :  { %230 = vpush %v172_v56  ;;  %v184_v58 = vrot.slane %v183_v55, 1  ;;  %v198_v60 = vadd.f32 %v197_v57, %v196_v51 }
  0xeb   :  { %v185_v59 = vadd.f32 %v184_v58, %v183_v55 }
  0xed   :  { %232 = vpush %v185_v59 }
  0xee   :  { %234 = vpush %v198_v60 }
  0xfa   :  { %s227_s2 = spop %226 }
  0xfb   :  { %v149_v61 = vstv %s227_s2 }
  0xfc   :  { %v150_v63 = vsel %vm148_vm1, %v149_v61, 0.0 }
 0x118   :  { %s229_s3 = spop %228 }
 0x119   :  { %v162_v62 = vstv %s229_s3 }
 0x11a   :  { %s231_s13 = spop %230  ;;  %v163_v0 = vsel %vm161_vm2, %v162_v62, %v150_v63 }
 0x11b   :  { %v175_v1 = vstv %s231_s13 }
 0x11c   :  { %v176_v3 = vsel %vm174_vm3, %v175_v1, %v163_v0 }
 0x11e   :  { %s233_s16 = spop %232 }
 0x11f   :  { %v188_v4 = vstv %s233_s16  ;;  %s235_s17 = spop %234 }
 0x120   :  { %v189_v5 = vsel %vm187_vm4, %v188_v4, %v176_v3  ;;  %v201_v6 = vstv %s235_s17 }
 0x121   :  { %v202_v7 = vsel %vm200_vm5, %v201_v6, %v189_v5 }
 0x122   :  { %203 = vst [vmem:[#allocation9] sm:$0x1] %v202_v7 }
 0x123   :  { %298 = shalt.err (!%p295_p6)
}
 0x124   :  { %s299_s21 = scalar_lea.hbm %s396_s4, 16 }
 0x125   :  { %p300_p7 = scmp.ne.s32.totalorder %s396_s4, %s299_s21  ;;  %p303_p8 = scmp.lt.u32.totalorder %s299_s21, %s396_s4 }
 0x127   :  { %p305_p9 = pnand %p303_p8, %p300_p7 }
 0x129   :  { %308 = shalt.err (!%p305_p9)
}
 0x12a   :  { %213 = dma.vmem_to_hbm [thread:$0]  %s211_s15, 16, %s396_s4, [#allocation6]  }
 0x12b   :  { %313 = dma.done.wait [#allocation6], 16  }
 0x12c   :  { %314 = vsyncadd [#allocation6], 4294967280 }
 0x12d   :  { %217 = vsyncpa [#allocation5], 1 }
 0x12e   :  { %218 = vsyncpa [#allocation8], 1 }
 0x12f   :  { %219 = vsyncpa [#allocation6], 1 }

</bundles_post_ra>
